<compile_context>
chip_gen: v5e
topology: v5e:2x2
jax: 0.10.0
libtpu: 0.0.40
codegen_flags: <defaults>
</compile_context>

<pallas_src>
import functools

import jax
import jax.numpy as jnp
from jax.experimental import pallas as pl
from jax.experimental.pallas import tpu as pltpu


# --------------------------------------------------------------------------
# Generation-aware budgets (all static Python, evaluated at trace time).
# --------------------------------------------------------------------------
def _tpu_generation():
    try:
        kind = jax.devices()[0].device_kind.lower()
    except Exception:
        return "unknown"
    if "v5" in kind:
        return "v5"
    if "v6" in kind:
        return "v6"
    if "v7" in kind or "7x" in kind:
        return "v7"
    return "unknown"


def _gen_config():
    gen = _tpu_generation()
    if gen in ("v5", "v6"):
        # 128 MiB physical VMEM, single TensorCore: biggest-DMA tiles.
        return dict(block_budget_bytes=12 * 1024 * 1024,
                    vmem_limit_bytes=64 * 1024 * 1024,
                    want_parallel_steps=1)
    if gen == "v7":
        # 64 MiB physical VMEM per TC, 2 TCs: tighter budget, >=2 grid steps
        # on the 'parallel' batch axis when possible.
        return dict(block_budget_bytes=6 * 1024 * 1024,
                    vmem_limit_bytes=32 * 1024 * 1024,
                    want_parallel_steps=2)
    return dict(block_budget_bytes=4 * 1024 * 1024,
                vmem_limit_bytes=32 * 1024 * 1024,
                want_parallel_steps=1)


def _cdiv(a, b):
    return (a + b - 1) // b


def _pick_batch_tile(batch, row_elems, max_elems, want_steps):
    """Largest divisor of `batch` (<= 64) whose block fits `max_elems`,
    preferring to reach `want_steps` grid steps (megacore on v7x).
    Returns None if even tb == 1 does not fit."""
    best = None
    for tb in range(1, min(batch, 64) + 1):
        if batch % tb or tb * row_elems > max_elems:
            continue
        key = (min(batch // tb, want_steps), tb)
        if best is None or key > best:
            best = key
    return best[1] if best else None


def _pick_lane_tile(hw, row_elems, max_elems):
    """Largest lane tile: a multiple of 128 (or the full HW when HW <= 128)."""
    if hw <= 128:
        return hw
    fit_units = max(1, min(hw // 128, max_elems // max(1, row_elems * 128)))
    return 128 * fit_units


# --------------------------------------------------------------------------
# Kernels.
# --------------------------------------------------------------------------
def _fused_kernel(x_ref, w1t_ref, b1_ref, w2t_ref, b2_ref, o_ref, *, inv_hw):
    """Single pass per batch-tile: mean -> FC -> ReLU -> FC -> sigmoid -> x*s."""
    x = x_ref[...]                                                 # (tb, C, HW)
    avg = jnp.sum(x.astype(jnp.float32), axis=-1) * inv_hw         # (tb, C)
    h = jnp.dot(avg, w1t_ref[...],
                preferred_element_type=jnp.float32) + b1_ref[...]  # (tb, Ch)
    h = jnp.maximum(h, 0.0)
    s = jnp.dot(h, w2t_ref[...],
                preferred_element_type=jnp.float32) + b2_ref[...]  # (tb, C)
    s = jax.nn.sigmoid(s).astype(x.dtype)
    o_ref[...] = (x * s[:, :, None]).astype(o_ref.dtype)


def _gate_kernel(x_ref, w1t_ref, b1_ref, w2t_ref, b2_ref, s_ref, *,
                 inv_hw, hw, thw):
    """Two-pass fallback, pass 1: accumulate spatial sums into the resident
    output block; run the excitation MLP on the last spatial step."""
    hw_i = pl.program_id(1)

    @pl.when(hw_i == 0)
    def _():
        s_ref[...] = jnp.zeros_like(s_ref)

    xf = x_ref[...].astype(jnp.float32)                            # (tb, C, thw)
    if hw % thw:  # static: mask the out-of-bounds spatial tail (no padding copy)
        lane = jax.lax.broadcasted_iota(jnp.int32, xf.shape, 2) + hw_i * thw
        xf = jnp.where(lane < hw, xf, 0.0)
    s_ref[...] += jnp.sum(xf, axis=-1)[None]                       # (1, tb, C)

    @pl.when(hw_i == pl.num_programs(1) - 1)
    def _():
        avg = s_ref[0] * inv_hw                                    # (tb, C)
        h = jnp.maximum(
            jnp.dot(avg, w1t_ref[...],
                    preferred_element_type=jnp.float32) + b1_ref[...], 0.0)
        s = jax.nn.sigmoid(
            jnp.dot(h, w2t_ref[...],
                    preferred_element_type=jnp.float32) + b2_ref[...])
        s_ref[...] = s[None]


def _scale_kernel(x_ref, s_ref, o_ref):
    """Two-pass fallback, pass 2: out = x * gate (elementwise, lane-dense)."""
    s = s_ref[0].astype(x_ref.dtype)                               # (tb, C)
    o_ref[...] = (x_ref[...] * s[:, :, None]).astype(o_ref.dtype)


# --------------------------------------------------------------------------
# Wrapper.
# --------------------------------------------------------------------------
def _senet_forward(x, w1, b1, w2, b2, *, force_two_pass=False):
    B, C, H, W = x.shape
    HW = H * W
    Ch = w1.shape[0]

    cfg = _gen_config()
    # Budget counted in f32-equivalent elements (covers the f32 reduction temps
    # even when x is bf16).
    max_elems = cfg["block_budget_bytes"] // 4
    want_steps = cfg["want_parallel_steps"]
    vmem_limit = cfg["vmem_limit_bytes"]

    x_flat = x.reshape(B, C, HW)                 # free: merges contiguous dims
    w1t = w1.T.astype(jnp.float32)               # (C, Ch)  pre-transposed once
    w2t = w2.T.astype(jnp.float32)               # (Ch, C)
    b1_2d = b1.reshape(1, Ch).astype(jnp.float32)
    b2_2d = b2.reshape(1, C).astype(jnp.float32)
    inv_hw = 1.0 / float(HW)

    weight_specs = [
        pl.BlockSpec((C, Ch), lambda *a: (0, 0)),   # w1.T
        pl.BlockSpec((1, Ch), lambda *a: (0, 0)),   # b1
        pl.BlockSpec((Ch, C), lambda *a: (0, 0)),   # w2.T
        pl.BlockSpec((1, C), lambda *a: (0, 0)),    # b2
    ]

    tb_fused = None if force_two_pass else _pick_batch_tile(
        B, C * HW, max_elems, want_steps)

    if tb_fused is not None:
        # ---- fused single pass: x read once, out written once ----
        # (On v7x with B == 1 the single grid step runs on one TC; splitting the
        #  spatial reduction across cores is not worth the complexity here.)
        out_flat = pl.pallas_call(
            functools.partial(_fused_kernel, inv_hw=inv_hw),
            out_shape=jax.ShapeDtypeStruct((B, C, HW), x.dtype),
            grid_spec=pltpu.PrefetchScalarGridSpec(
                num_scalar_prefetch=0,
                grid=(B // tb_fused,),
                in_specs=[pl.BlockSpec((tb_fused, C, HW), lambda b: (b, 0, 0))]
                + weight_specs,
                out_specs=pl.BlockSpec((tb_fused, C, HW), lambda b: (b, 0, 0)),
            ),
            compiler_params=pltpu.CompilerParams(
                dimension_semantics=("parallel",),
                vmem_limit_bytes=vmem_limit),
        )(x_flat, w1t, b1_2d, w2t, b2_2d)
        return out_flat.reshape(B, C, H, W)

    # ---- two-pass fallback (full-spatial block does not fit VMEM) ----
    tb = _pick_batch_tile(B, C * 128, max_elems, want_steps) or 1
    batch_steps = B // tb
    thw = _pick_lane_tile(HW, tb * C, max_elems)   # largest fitting lane tile
    hw_steps = _cdiv(HW, thw)

    # Pass 1: gate = sigmoid(relu(mean @ w1.T + b1) @ w2.T + b2), shape
    # (batch_steps, tb, C) so every block has full last-two dims.
    gate = pl.pallas_call(
        functools.partial(_gate_kernel, inv_hw=inv_hw, hw=HW, thw=thw),
        out_shape=jax.ShapeDtypeStruct((batch_steps, tb, C), jnp.float32),
        grid_spec=pltpu.PrefetchScalarGridSpec(
            num_scalar_prefetch=0,
            grid=(batch_steps, hw_steps),
            in_specs=[pl.BlockSpec((tb, C, thw), lambda b, h: (b, 0, h))]
            + weight_specs,
            out_specs=pl.BlockSpec((1, tb, C), lambda b, h: (b, 0, 0)),
        ),
        compiler_params=pltpu.CompilerParams(
            dimension_semantics=("parallel", "arbitrary"),
            vmem_limit_bytes=vmem_limit),
    )(x_flat, w1t, b1_2d, w2t, b2_2d)

    # Pass 2: out = x * gate, both grid axes parallel, lane-dense tiles.
    out_flat = pl.pallas_call(
        _scale_kernel,
        out_shape=jax.ShapeDtypeStruct((B, C, HW), x.dtype),
        grid_spec=pltpu.PrefetchScalarGridSpec(
            num_scalar_prefetch=0,
            grid=(batch_steps, hw_steps),
            in_specs=[
                pl.BlockSpec((tb, C, thw), lambda b, h: (b, 0, h)),
                pl.BlockSpec((1, tb, C), lambda b, h: (b, 0, 0)),
            ],
            out_specs=pl.BlockSpec((tb, C, thw), lambda b, h: (b, 0, h)),
        ),
        compiler_params=pltpu.CompilerParams(
            dimension_semantics=("parallel", "parallel"),
            vmem_limit_bytes=vmem_limit),
    )(x_flat, gate)

    return out_flat.reshape(B, C, H, W)


senet_pallas = jax.jit(_senet_forward)
senet_pallas_two_pass = jax.jit(functools.partial(_senet_forward,
                                                  force_two_pass=True))


def senet_ref(x, w1, b1, w2, b2):
    avg = jnp.mean(x, axis=(2, 3))                               # (B, C)
    h = jnp.maximum(avg @ w1.T + b1, 0.0)                        # (B, C//r)
    s = jax.nn.sigmoid(h @ w2.T + b2)                            # (B, C)
    return x * s[:, :, None, None]


if __name__ == "__main__":
    key = jax.random.PRNGKey(0)
    B, C, H, W = 2, 64, 16, 16
    ratio = 16
    Ch = C // ratio

    kx, k1, k2, k3, k4 = jax.random.split(key, 5)
    x = jax.random.normal(kx, (B, C, H, W), dtype=jnp.float32)
    # nn.Linear-style deterministic init: U(-1/sqrt(fan_in), 1/sqrt(fan_in))
    lim1 = 1.0 / (C ** 0.5)
    lim2 = 1.0 / (Ch ** 0.5)
    w1 = jax.random.uniform(k1, (Ch, C), jnp.float32, -lim1, lim1)
    b1 = jax.random.uniform(k2, (Ch,), jnp.float32, -lim1, lim1)
    w2 = jax.random.uniform(k3, (C, Ch), jnp.float32, -lim2, lim2)
    b2 = jax.random.uniform(k4, (C,), jnp.float32, -lim2, lim2)

    # Fused single-pass path (common case).
    out = jax.block_until_ready(senet_pallas(x, w1, b1, w2, b2))
    ref = jax.block_until_ready(senet_ref(x, w1, b1, w2, b2))
    assert out.shape == (B, C, H, W)
    assert jnp.allclose(out, ref, atol=1e-5, rtol=1e-5), "fused path mismatch"

    # Two-pass fallback path, with a spatial size that is NOT a multiple of 128
    # (exercises the in-kernel tail masking instead of pad/slice copies).
    H2, W2 = 15, 20
    x2 = jax.random.normal(kx, (B, C, H2, W2), dtype=jnp.float32)
    out2 = jax.block_until_ready(senet_pallas_two_pass(x2, w1, b1, w2, b2))
    ref2 = jax.block_until_ready(senet_ref(x2, w1, b1, w2, b2))
    assert out2.shape == (B, C, H2, W2)
    assert jnp.allclose(out2, ref2, atol=1e-5, rtol=1e-5), "two-pass mismatch"

    print("KERNEL_OK")
</pallas_src>

<mosaic_0001>
module attributes {stable_mosaic.version = 11 : i64} {
  func.func @_fused_kernel(%arg0: i32, %arg1: memref<2x64x256xf32, #tpu.memory_space<vmem>>, %arg2: memref<64x4xf32, #tpu.memory_space<vmem>>, %arg3: memref<1x4xf32, #tpu.memory_space<vmem>>, %arg4: memref<4x64xf32, #tpu.memory_space<vmem>>, %arg5: memref<1x64xf32, #tpu.memory_space<vmem>>, %arg6: memref<2x64x256xf32, #tpu.memory_space<vmem>>) attributes {dimension_semantics = [#tpu.dimension_semantics<parallel>], iteration_bounds = array<i64: 1>, scalar_prefetch = 0 : i64, scratch_operands = 0 : i64, tpu.core_type = #tpu.core_type<tc>, window_params = [{transform_indices = @transform_0, window_bounds = array<i64: 2, 64, 256>}, {pipeline_mode = #tpu.pipeline_mode<synchronous>, transform_indices = @transform_1, window_bounds = array<i64: 64, 4>}, {pipeline_mode = #tpu.pipeline_mode<synchronous>, transform_indices = @transform_2, window_bounds = array<i64: 1, 4>}, {pipeline_mode = #tpu.pipeline_mode<synchronous>, transform_indices = @transform_3, window_bounds = array<i64: 4, 64>}, {pipeline_mode = #tpu.pipeline_mode<synchronous>, transform_indices = @transform_4, window_bounds = array<i64: 1, 64>}, {transform_indices = @transform_5, window_bounds = array<i64: 2, 64, 256>}]} {
    %c0 = arith.constant 0 : index
    %c0_0 = arith.constant 0 : index
    %c0_1 = arith.constant 0 : index
    %0 = vector.load %arg1[%c0, %c0_0, %c0_1] : memref<2x64x256xf32, #tpu.memory_space<vmem>>, vector<2x64x256xf32>
    %cst = arith.constant dense<0.000000e+00> : vector<2x64xf32>
    %1 = vector.multi_reduction <add>, %0, %cst [2] : vector<2x64x256xf32> to vector<2x64xf32>
    %cst_2 = arith.constant 3.906250e-03 : f32
    %2 = vector.broadcast %cst_2 : f32 to vector<2x64xf32>
    %3 = arith.mulf %1, %2 : vector<2x64xf32>
    %c0_3 = arith.constant 0 : index
    %c0_4 = arith.constant 0 : index
    %4 = vector.load %arg2[%c0_3, %c0_4] : memref<64x4xf32, #tpu.memory_space<vmem>>, vector<64x4xf32>
    %cst_5 = arith.constant dense<0.000000e+00> : vector<2x4xf32>
    %5 = tpu.matmul %3, %4, %cst_5 {dimension_numbers = #tpu.dot_dimension_numbers<[1], [0], [0], [1], [0, 0, 1, 1], [], []>} : vector<2x64xf32>, vector<64x4xf32>, vector<2x4xf32> -> vector<2x4xf32>
    %c0_6 = arith.constant 0 : index
    %c0_7 = arith.constant 0 : index
    %6 = vector.load %arg3[%c0_6, %c0_7] : memref<1x4xf32, #tpu.memory_space<vmem>>, vector<1x4xf32>
    %7 = vector.broadcast %6 : vector<1x4xf32> to vector<2x4xf32>
    %8 = arith.addf %5, %7 : vector<2x4xf32>
    %cst_8 = arith.constant 0.000000e+00 : f32
    %9 = vector.broadcast %cst_8 : f32 to vector<2x4xf32>
    %10 = arith.maximumf %8, %9 : vector<2x4xf32>
    %c0_9 = arith.constant 0 : index
    %c0_10 = arith.constant 0 : index
    %11 = vector.load %arg4[%c0_9, %c0_10] : memref<4x64xf32, #tpu.memory_space<vmem>>, vector<4x64xf32>
    %cst_11 = arith.constant dense<0.000000e+00> : vector<2x64xf32>
    %12 = tpu.matmul %10, %11, %cst_11 {dimension_numbers = #tpu.dot_dimension_numbers<[1], [0], [0], [1], [0, 0, 1, 1], [], []>} : vector<2x4xf32>, vector<4x64xf32>, vector<2x64xf32> -> vector<2x64xf32>
    %c0_12 = arith.constant 0 : index
    %c0_13 = arith.constant 0 : index
    %13 = vector.load %arg5[%c0_12, %c0_13] : memref<1x64xf32, #tpu.memory_space<vmem>>, vector<1x64xf32>
    %14 = vector.broadcast %13 : vector<1x64xf32> to vector<2x64xf32>
    %15 = arith.addf %12, %14 : vector<2x64xf32>
    %16 = arith.negf %15 : vector<2x64xf32>
    %17 = math.exp %16 : vector<2x64xf32>
    %cst_14 = arith.constant 1.000000e+00 : f32
    %18 = vector.broadcast %cst_14 : f32 to vector<2x64xf32>
    %19 = arith.addf %18, %17 : vector<2x64xf32>
    %20 = arith.divf %18, %19 : vector<2x64xf32>
    %21 = vector.shape_cast %20 : vector<2x64xf32> to vector<2x64x1xf32>
    %22 = vector.broadcast %21 : vector<2x64x1xf32> to vector<2x64x256xf32>
    %23 = arith.mulf %0, %22 : vector<2x64x256xf32>
    %c0_15 = arith.constant 0 : index
    %c0_16 = arith.constant 0 : index
    %c0_17 = arith.constant 0 : index
    %24 = vector.load %arg6[%c0_15, %c0_16, %c0_17] : memref<2x64x256xf32, #tpu.memory_space<vmem>>, vector<2x64x256xf32>
    tpu.vector_store %arg6[%c0_15, %c0_16, %c0_17], %23 {strides = array<i32>} : memref<2x64x256xf32, #tpu.memory_space<vmem>>, vector<2x64x256xf32>,
    return
  }
  func.func @transform_0(%arg0: i32) -> (i32, i32, i32) {
    %c0_i32 = arith.constant 0 : i32
    %c0_i32_0 = arith.constant 0 : i32
    %c0_i32_1 = arith.constant 0 : i32
    return %arg0, %c0_i32, %c0_i32_0 : i32, i32, i32
  }
  func.func @transform_1(%arg0: i32) -> (i32, i32) {
    %c0_i32 = arith.constant 0 : i32
    %c0_i32_0 = arith.constant 0 : i32
    %c0_i32_1 = arith.constant 0 : i32
    return %c0_i32, %c0_i32_0 : i32, i32
  }
  func.func @transform_2(%arg0: i32) -> (i32, i32) {
    %c0_i32 = arith.constant 0 : i32
    %c0_i32_0 = arith.constant 0 : i32
    %c0_i32_1 = arith.constant 0 : i32
    return %c0_i32, %c0_i32_0 : i32, i32
  }
  func.func @transform_3(%arg0: i32) -> (i32, i32) {
    %c0_i32 = arith.constant 0 : i32
    %c0_i32_0 = arith.constant 0 : i32
    %c0_i32_1 = arith.constant 0 : i32
    return %c0_i32, %c0_i32_0 : i32, i32
  }
  func.func @transform_4(%arg0: i32) -> (i32, i32) {
    %c0_i32 = arith.constant 0 : i32
    %c0_i32_0 = arith.constant 0 : i32
    %c0_i32_1 = arith.constant 0 : i32
    return %c0_i32, %c0_i32_0 : i32, i32
  }
  func.func @transform_5(%arg0: i32) -> (i32, i32, i32) {
    %c0_i32 = arith.constant 0 : i32
    %c0_i32_0 = arith.constant 0 : i32
    %c0_i32_1 = arith.constant 0 : i32
    return %arg0, %c0_i32, %c0_i32_0 : i32, i32, i32
  }
}

</mosaic_0001>

<bundles_post_ra>
// kernel: _senet_forward.1
= control target key start
LH: loop header
LB: loop body
LE: loop exit
PB: predicated region body
PF: predicated region fallthrough
CT: control target
= control target key end

     0   :  { %vm149_vm0 = vcmask 130112   ;;  %vm153_vm1 = vcmask 195712   ;;  %vm157_vm2 = vcmask 261312   ;;  %vm161_vm3 = vcmask 326912   ;;  %s854_s0 = inlined_call_operand.vmem [shape: f32[2,64,256], index: 0, kind: input, shape index: {}]   ;;  %s855_s2 = inlined_call_operand.vmem [shape: f32[1,4], index: 2, kind: input, shape index: {}]   ;;  %s856_s1 = inlined_call_operand.vmem [shape: f32[64,4], index: 1, kind: input, shape index: {}]   ;;  %s857_s4 = inlined_call_operand.vmem [shape: f32[1,64], index: 4, kind: input, shape index: {}]   ;;  %s858_s3 = inlined_call_operand.vmem [shape: f32[4,64], index: 3, kind: input, shape index: {}]   ;;  %s859_s5 = inlined_call_operand.vmem [shape: f32[2,64,256], index: 5, kind: output, shape index: {}]  }
   0x1   :  { %v494_v0 = vld [vmem:[%s854_s0 + $0x80] sm:$0xff]  ;;  %v499_v1 = vld [vmem:[%s854_s0 + $0x88] sm:$0xff]  ;;  %v530_v9 = vld [vmem:[%s854_s0 + $0x90] sm:$0xff]  ;;  %vm165_vm4 = vcmask 392512   ;;  %vm169_vm5 = vcmask 458112   ;;  %vm173_vm6 = vcmask 523712  }
   0x2   :  { %v504_v2 = vld [vmem:[%s854_s0] sm:$0xff]  ;;  %v76_v3 = vadd.f32 %v499_v1, %v494_v0  ;;  %v511_v4 = vld [vmem:[%s854_s0 + $0x8] sm:$0xff]  ;;  %v535_v10 = vld [vmem:[%s854_s0 + $0x98] sm:$0xff]  ;;  %vm190_vm7 = vcmask 1041409   ;;  %vm192_vm8 = vcmask 523264   ;;  %vm225_vm9 = vcmask 1043456  }
   0x3   :  { %v516_v5 = vld [vmem:[%s854_s0 + $0x20] sm:$0xff]  ;;  %v521_v6 = vld [vmem:[%s854_s0 + $0x28] sm:$0xff]  ;;  %v52_v7 = vadd.f32 %v511_v4, %v504_v2  ;;  %v540_v11 = vld [vmem:[%s854_s0 + $0x10] sm:$0xff]  ;;  %v79_v15 = vadd.f32 %v535_v10, %v530_v9  ;;  %vm221_vm10 = vcmask 31744  }
   0x4   :  { %v58_v8 = vadd.f32 %v521_v6, %v516_v5  ;;  %77 = vadd.xlane.f32.xlu1 %v76_v3  ;;  %v545_v12 = vld [vmem:[%s854_s0 + $0x18] sm:$0xff]  ;;  %v550_v13 = vld [vmem:[%s854_s0 + $0xa0] sm:$0xff]  ;;  %v555_v14 = vld [vmem:[%s854_s0 + $0xa8] sm:$0xff] }
   0x5   :  { %53 = vadd.xlane.f32.xlu0 %v52_v7  ;;  %v55_v16 = vadd.f32 %v545_v12, %v540_v11  ;;  %v82_v17 = vadd.f32 %v555_v14, %v550_v13  ;;  %v566_v18 = vld [vmem:[%s854_s0 + $0xb0] sm:$0xff]  ;;  %v571_v19 = vld [vmem:[%s854_s0 + $0xb8] sm:$0xff]  ;;  %v586_v22 = vld [vmem:[%s854_s0 + $0x40] sm:$0xff]  ;;  %v860_v7 = vlaneseq }
   0x6   :  { %59 = vadd.xlane.f32.xlu2 %v58_v8  ;;  %v576_v20 = vld [vmem:[%s854_s0 + $0x30] sm:$0xff]  ;;  %v581_v21 = vld [vmem:[%s854_s0 + $0x38] sm:$0xff]  ;;  %v591_v23 = vld [vmem:[%s854_s0 + $0x48] sm:$0xff]  ;;  %v85_v24 = vadd.f32 %v571_v19, %v566_v18 }
   0x7   :  { %v61_v25 = vadd.f32 %v581_v21, %v576_v20  ;;  %v64_v26 = vadd.f32 %v591_v23, %v586_v22  ;;  %v602_v27 = vld [vmem:[%s854_s0 + $0x50] sm:$0xff]  ;;  %v607_v28 = vld [vmem:[%s854_s0 + $0x58] sm:$0xff]  ;;  %v612_v29 = vld [vmem:[%s854_s0 + $0xc0] sm:$0xff]  ;;  %v145_v8 = vand.u32 127, %v860_v7 }
   0x8   :  { %v617_v30 = vld [vmem:[%s854_s0 + $0xc8] sm:$0xff]  ;;  %v622_v31 = vld [vmem:[%s854_s0 + $0xd0] sm:$0xff]  ;;  %v627_v32 = vld [vmem:[%s854_s0 + $0xd8] sm:$0xff]  ;;  %v67_v33 = vadd.f32 %v607_v28, %v602_v27 }
   0x9   :  { %863 = vst [vmem:[#allocation2_spill] sm:$0xff] %v622_v31  ;;  %v88_v34 = vadd.f32 %v617_v30, %v612_v29  ;;  %v91_v35 = vadd.f32 %v627_v32, %v622_v31  ;;  %v638_v36 = vld [vmem:[%s854_s0 + $0xe0] sm:$0xff]  ;;  %v643_v37 = vld [vmem:[%s854_s0 + $0xe8] sm:$0xff]  ;;  %v658_v40 = vld [vmem:[%s854_s0 + $0x70] sm:$0xff] }
   0xa   :  { %864 = vst [vmem:[#allocation3_spill] sm:$0xff] %v627_v32  ;;  %v648_v38 = vld [vmem:[%s854_s0 + $0x60] sm:$0xff]  ;;  %v653_v39 = vld [vmem:[%s854_s0 + $0x68] sm:$0xff]  ;;  %v663_v41 = vld [vmem:[%s854_s0 + $0x78] sm:$0xff]  ;;  %v94_v42 = vadd.f32 %v643_v37, %v638_v36 }
   0xb   :  { %v70_v43 = vadd.f32 %v653_v39, %v648_v38  ;;  %v73_v44 = vadd.f32 %v663_v41, %v658_v40  ;;  %v674_v45 = vld [vmem:[%s854_s0 + $0xf0] sm:$0xff]  ;;  %v679_v46 = vld [vmem:[%s854_s0 + $0xf8] sm:$0xff]  ;;  %v121_v53 = vld [vmem:[%s856_s1 + $0x28] sm:$0xff] }
   0xc   :  { %80 = vadd.xlane.f32.xlu1 %v79_v15  ;;  %v97_v47 = vadd.f32 %v679_v46, %v674_v45  ;;  %v123_v48 = vld [vmem:[%s856_s1 + $0x38] sm:$0xff]  ;;  %v122_v52 = vld [vmem:[%s856_s1 + $0x30] sm:$0xff]  ;;  %v120_v54 = vld [vmem:[%s856_s1 + $0x20] sm:$0xff] }
   0xd   :  { %56 = vadd.xlane.f32.xlu0 %v55_v16  ;;  %203 = vmatpush.msra.mxu0 %v123_v48  ;;  %v119_v55 = vld [vmem:[%s856_s1 + $0x18] sm:$0xff]  ;;  %v118_v59 = vld [vmem:[%s856_s1 + $0x10] sm:$0xff]  ;;  %v117_v60 = vld [vmem:[%s856_s1 + $0x8] sm:$0xff] }
   0xe   :  { %83 = vadd.xlane.f32.xlu2 %v82_v17  ;;  %v116_v61 = vld [vmem:[%s856_s1] sm:$0xff] }
   0xf   :  { %204 = vmatpush.msra.mxu0 %v122_v52 }
  0x11   :  { %205 = vmatpush.msra.mxu0 %v121_v53 }
  0x13   :  { %206 = vmatpush.msra.mxu0 %v120_v54 }
  0x14   :  { %86 = vadd.xlane.f32.xlu1 %v85_v24  ;;  %v147_v24 = vadd.s32 4294967288, %v145_v8 }
  0x15   :  { %62 = vadd.xlane.f32.xlu0 %v61_v25  ;;  %207 = vmatpush.msra.mxu0 %v119_v55 }
  0x16   :  { %65 = vadd.xlane.f32.xlu2 %v64_v26 }
  0x17   :  { %208 = vmatpush.msra.mxu0 %v118_v59 }
  0x19   :  { %209 = vmatpush.msra.mxu0 %v117_v60  ;;  %v159_v60 = vadd.s32 4294967264, %v145_v8 }
  0x1b   :  { %210 = vmatpush.msra.mxu0 %v116_v61 }
  0x1c   :  { %68 = vadd.xlane.f32.xlu1 %v67_v33 }
  0x1d   :  { %89 = vadd.xlane.f32.xlu0 %v88_v34 }
  0x1e   :  { %92 = vadd.xlane.f32.xlu2 %v91_v35  ;;  %v151_v35 = vadd.s32 4294967280, %v145_v8 }
  0x24   :  { %95 = vadd.xlane.f32.xlu1 %v94_v42 }
  0x25   :  { %71 = vadd.xlane.f32.xlu0 %v70_v43 }
  0x26   :  { %74 = vadd.xlane.f32.xlu2 %v73_v44  ;;  %v155_v44 = vadd.s32 4294967272, %v145_v8 }
  0x2d   :  { %98 = vadd.xlane.f32.xlu0 %v97_v47 }
  0x77   :  { %v78_v49 = vpop.xlane.xlu1 %77 }
  0x78   :  { %v54_v50 = vpop.xlane.xlu0 %53  ;;  %v108_v26 = vmul.f32 0.00390625, %v78_v49 }
  0x79   :  { %v60_v51 = vpop.xlane.xlu2 %59  ;;  %v100_v33 = vmul.f32 0.00390625, %v54_v50 }
  0x7a   :  { %v102_v42 = vmul.f32 0.00390625, %v60_v51  ;;  %v175_v52 = vperm.slane %v108_v26, %v145_v8 }
  0x7b   :  { %v146_v53 = vperm.slane %v100_v33, %v145_v8 }
  0x7c   :  { %v152_v59 = vperm.slane %v102_v42, %v151_v35 }
  0x7f   :  { %v81_v56 = vpop.xlane.xlu1 %80 }
  0x80   :  { %v57_v57 = vpop.xlane.xlu0 %56  ;;  %v109_v34 = vmul.f32 0.00390625, %v81_v56  ;;  %v163_v56 = vadd.s32 4294967256, %v145_v8 }
  0x81   :  { %v84_v58 = vpop.xlane.xlu2 %83  ;;  %v101_v25 = vmul.f32 0.00390625, %v57_v57 }
  0x82   :  { %v110_v48 = vmul.f32 0.00390625, %v84_v58  ;;  %v176_v54 = vperm.slane %v109_v34, %v147_v24 }
  0x83   :  { %v148_v43 = vperm.slane %v101_v25, %v147_v24 }
  0x84   :  { %v178_v32 = vperm.slane %v110_v48, %v151_v35  ;;  %v177_v26 = vsel %vm149_vm0, %v176_v54, %v175_v52 }
  0x85   :  { %v150_v49 = vsel %vm149_vm0, %v148_v43, %v146_v53 }
  0x86   :  { %v179_v35 = vsel %vm153_vm1, %v178_v32, %v177_v26  ;;  %v865_v26 = vlaneseq }
  0x87   :  { %v87_v62 = vpop.xlane.xlu1 %86 }
  0x88   :  { %v63_v63 = vpop.xlane.xlu0 %62  ;;  %v111_v55 = vmul.f32 0.00390625, %v87_v62 }
  0x89   :  { %v66_v3 = vpop.xlane.xlu2 %65  ;;  %v103_v47 = vmul.f32 0.00390625, %v63_v63  ;;  %v167_v63 = vadd.s32 4294967248, %v145_v8 }
  0x8a   :  { %v104_v61 = vmul.f32 0.00390625, %v66_v3  ;;  %v180_v24 = vperm.slane %v111_v55, %v155_v44  ;;  %v154_v3 = vsel %vm153_vm1, %v152_v59, %v150_v49 }
  0x8b   :  { %v156_v50 = vperm.slane %v103_v47, %v155_v44 }
  0x8c   :  { %v181_v53 = vsel %vm157_vm2, %v180_v24, %v179_v35  ;;  %v270_v24 = vshrl.u32 %v865_v26, 7 }
  0x8d   :  { %v158_v42 = vsel %vm157_vm2, %v156_v50, %v154_v3 }
  0x8e   :  { %438 = vset.pattern.permute.xlu1 %v270_v24  ;;  %v277_v3 = vadd.s32 8, %v270_v24 }
  0x8f   :  { %v69_v15 = vpop.xlane.xlu1 %68 }
  0x90   :  { %v90_v16 = vpop.xlane.xlu0 %89  ;;  %v105_v51 = vmul.f32 0.00390625, %v69_v15  ;;  %v171_v15 = vadd.s32 4294967240, %v145_v8  ;;  %439 = vset.pattern.permute.xlu2 %v277_v3 }
  0x91   :  { %v93_v17 = vpop.xlane.xlu2 %92  ;;  %v112_v7 = vmul.f32 0.00390625, %v90_v16  ;;  %v160_v16 = vperm.slane %v104_v61, %v159_v60 }
  0x92   :  { %v113_v62 = vmul.f32 0.00390625, %v93_v17  ;;  %v164_v43 = vperm.slane %v105_v51, %v163_v56  ;;  %v455_v51 = vld [vmem:[%s855_s2] ss:$0 sm:$0xff] }
  0x93   :  { %v182_v33 = vperm.slane %v112_v7, %v159_v60  ;;  %v162_v17 = vsel %vm161_vm3, %v160_v16, %v158_v42  ;;  %v456_v16 = vld [vmem:[%s857_s4] ss:$0 sm:$0xff] }
  0x94   :  { %v184_v52 = vperm.slane %v113_v62, %v163_v56  ;;  %v166_v55 = vsel %vm165_vm4, %v164_v43, %v162_v17  ;;  %v216_v56 = vld [vmem:[%s858_s3] sm:$0xf]  ;;  %v283_v62 = vadd.s32 16, %v270_v24 }
  0x95   :  { %v183_v44 = vsel %vm161_vm3, %v182_v33, %v181_v53  ;;  %435 = vmatpush.msk.msra.mxu1 %vm225_vm9, %v216_v56 }
  0x96   :  { %v185_v8 = vsel %vm165_vm4, %v184_v52, %v183_v44  ;;  %440 = vset.pattern.permute.xlu0 %v283_v62 }
  0x97   :  { %v96_v25 = vpop.xlane.xlu1 %95 }
  0x98   :  { %v72_v57 = vpop.xlane.xlu0 %71  ;;  %v114_v34 = vmul.f32 0.00390625, %v96_v25 }
  0x99   :  { %v106_v31 = vmul.f32 0.00390625, %v72_v57  ;;  %v75_v58 = vpop.xlane.xlu2 %74 }
  0x9a   :  { %v107_v47 = vmul.f32 0.00390625, %v75_v58  ;;  %v186_v54 = vperm.slane %v114_v34, %v167_v63 }
  0x9b   :  { %v168_v48 = vperm.slane %v106_v31, %v167_v63 }
  0x9c   :  { %v172_v59 = vperm.slane %v107_v47, %v171_v15  ;;  %v187_v32 = vsel %vm169_vm5, %v186_v54, %v185_v8 }
  0x9d   :  { %v170_v61 = vsel %vm169_vm5, %v168_v48, %v166_v55 }
  0x9e   :  { %v174_v31 = vsel %vm173_vm6, %v172_v59, %v170_v61  ;;  %v295_v61 = vadd.s32 32, %v270_v24 }
  0xa0   :  { %v99_v7 = vpop.xlane.xlu0 %98 }
  0xa1   :  { %v115_v60 = vmul.f32 0.00390625, %v99_v7 }
  0xa3   :  { %v188_v57 = vperm.slane %v115_v60, %v171_v15  ;;  %v289_v60 = vadd.s32 24, %v270_v24 }
  0xa5   :  { %v189_v49 = vsel %vm173_vm6, %v188_v57, %v187_v32  ;;  %v307_v57 = vadd.s32 48, %v270_v24  ;;  %v301_v32 = vadd.s32 40, %v270_v24 }
  0xa6   :  { %v191_v50 = vsel %vm190_vm7, %v189_v49, %v174_v31  ;;  %v313_v31 = vadd.s32 56, %v270_v24 }
  0xa7   :  { %434 = vmatmul.msk.f32.vlgmr.msra.gmra.mxu0 %vm192_vm8, %v191_v50 }
 0x124   :  { %v212_v25 = vpop.f32.mrf.mxu0 }
 0x125   :  { %v213_v63 = vadd.f32 %v455_v51, %v212_v25 }
 0x127   :  { %v215_v58 = vmax.f32 %v213_v63, 0.0 }
 0x129   :  { %436 = vmatmul.msk.f32.vlgmr.msra.gmra.mxu1 %vm221_vm10, %v215_v58 }
 0x1a6   :  { %v246_v33 = vpop.f32.mrf.mxu1 }
 0x1a7   :  { %v247_v34 = vadd.f32 %v456_v16, %v246_v33 }
 0x1a9   :  { %v437_v42 = vmul.f32 -1.442695, %v247_v34 }
 0x1ab   :  { %457 = vpow2.f32 %v437_v42 }
 0x1b1   :  { %v458_v43 = vpop.eup %457 }
 0x1b2   :  { %v252_v15 = vadd.f32 1.0, %v458_v43 }
 0x1b4   :  { %459 = vrcp.f32 %v252_v15  ;;  %v264_v53 = vand.u32 2147483648, %v252_v15  ;;  %v262_v17 = vand.u32 2147483647, %v252_v15  ;;  %vm258_vm12 = vweird.f32 %v252_v15 }
 0x1b6   :  { %v265_v54 = vor.u32 1.1754944e-38, %v264_v53  ;;  %vm263_vm14 = vcmp.eq.f32.partialorder %v262_v17, 8.507059e+37  ;;  %v867_v53 = vld [vmem:[#allocation3_spill] sm:$0xff] }
 0x1ba   :  { %v460_v47 = vpop.eup %459 }
 0x1bb   :  { %v254_v35 = vmul.f32 %v460_v47, %v252_v15  ;;  %vm259_vm11 = vweird.f32 %v460_v47 }
 0x1bc   :  { %vm260_vm13 = vmor %vm258_vm12, %vm259_vm11 }
 0x1bd   :  { %v255_v48 = vsub.f32 1.0, %v254_v35 }
 0x1bf   :  { %v256_v52 = vmul.f32 %v460_v47, %v255_v48 }
 0x1c1   :  { %v257_v44 = vadd.f32 %v460_v47, %v256_v52 }
 0x1c3   :  { %v261_v7 = vsel %vm260_vm13, %v460_v47, %v257_v44 }
 0x1c4   :  { %v266_v55 = vsel %vm263_vm14, %v265_v54, %v261_v7 }
 0x1c5   :  { %v268_v59 = vperm.slane %v266_v55, 0  ;;  %v317_v8 = vperm.slane %v266_v55, 1 }
 0x1c7   :  { %285 = vperm.xlu0 %440, %v268_v59   ;;  %279 = vperm.xlu2 %439, %v268_v59  }
 0x1c8   :  { %273 = vperm.xlu1 %438, %v268_v59  }
 0x1cf   :  { %447 = vset.pattern.permute.xlu0 %v277_v3  ;;  %441 = vset.pattern.permute.xlu2 %v289_v60 }
 0x1d0   :  { %442 = vset.pattern.permute.xlu1 %v295_v61 }
 0x1d7   :  { %328 = vperm.xlu0 %447, %v317_v8   ;;  %291 = vperm.xlu2 %441, %v268_v59  }
 0x1d8   :  { %297 = vperm.xlu1 %442, %v268_v59  }
 0x1df   :  { %452 = vset.pattern.permute.xlu0 %v307_v57  ;;  %443 = vset.pattern.permute.xlu2 %v301_v32 }
 0x1e0   :  { %444 = vset.pattern.permute.xlu1 %v307_v57 }
 0x1e7   :  { %358 = vperm.xlu0 %452, %v317_v8   ;;  %303 = vperm.xlu2 %443, %v268_v59  }
 0x1e8   :  { %309 = vperm.xlu1 %444, %v268_v59  }
 0x1ef   :  { %445 = vset.pattern.permute.xlu2 %v313_v31  ;;  %454 = vset.pattern.permute.xlu0 %v313_v31 }
 0x1f0   :  { %446 = vset.pattern.permute.xlu1 %v270_v24 }
 0x1f7   :  { %315 = vperm.xlu2 %445, %v268_v59  }
 0x1f8   :  { %322 = vperm.xlu1 %446, %v317_v8  }
 0x1ff   :  { %448 = vset.pattern.permute.xlu2 %v283_v62 }
 0x200   :  { %449 = vset.pattern.permute.xlu1 %v289_v60 }
 0x207   :  { %334 = vperm.xlu2 %448, %v317_v8  }
 0x208   :  { %340 = vperm.xlu1 %449, %v317_v8  }
 0x20f   :  { %450 = vset.pattern.permute.xlu2 %v295_v61 }
 0x210   :  { %451 = vset.pattern.permute.xlu1 %v301_v32 }
 0x217   :  { %346 = vperm.xlu2 %450, %v317_v8  }
 0x218   :  { %352 = vperm.xlu1 %451, %v317_v8  }
 0x21f   :  { %453 = vset.pattern.permute.xlu2 %v313_v31 }
 0x221   :  { %v280_v49 = vpop.permute.xlu2 %279 }
 0x222   :  { %v368_v50 = vmul.f32 %v280_v49, %v540_v11  ;;  %v369_v56 = vmul.f32 %v280_v49, %v545_v12 }
 0x224   :  { %400 = vst [vmem:[%s859_s5 + $0x10] sm:$0xff] %v368_v50 }
 0x225   :  { %401 = vst [vmem:[%s859_s5 + $0x18] sm:$0xff] %v369_v56 }
 0x227   :  { %364 = vperm.xlu2 %453, %v317_v8  }
 0x231   :  { %v292_v51 = vpop.permute.xlu2 %291 }
 0x232   :  { %v372_v25 = vmul.f32 %v292_v51, %v576_v20  ;;  %v373_v63 = vmul.f32 %v292_v51, %v581_v21 }
 0x234   :  { %404 = vst [vmem:[%s859_s5 + $0x30] sm:$0xff] %v372_v25 }
 0x235   :  { %405 = vst [vmem:[%s859_s5 + $0x38] sm:$0xff] %v373_v63 }
 0x239   :  { %v286_v11 = vpop.permute.xlu0 %285 }
 0x23a   :  { %v370_v12 = vmul.f32 %v286_v11, %v516_v5  ;;  %v371_v58 = vmul.f32 %v286_v11, %v521_v6  ;;  %v274_v26 = vpop.permute.xlu1 %273 }
 0x23b   :  { %v366_v24 = vmul.f32 %v274_v26, %v504_v2  ;;  %v367_v20 = vmul.f32 %v274_v26, %v511_v4 }
 0x23c   :  { %402 = vst [vmem:[%s859_s5 + $0x20] sm:$0xff] %v370_v12 }
 0x23d   :  { %403 = vst [vmem:[%s859_s5 + $0x28] sm:$0xff] %v371_v58 }
 0x23e   :  { %398 = vst [vmem:[%s859_s5] sm:$0xff] %v366_v24 }
 0x23f   :  { %399 = vst [vmem:[%s859_s5 + $0x8] sm:$0xff] %v367_v20 }
 0x241   :  { %v304_v5 = vpop.permute.xlu2 %303 }
 0x242   :  { %v376_v2 = vmul.f32 %v304_v5, %v602_v27  ;;  %v377_v4 = vmul.f32 %v304_v5, %v607_v28 }
 0x244   :  { %408 = vst [vmem:[%s859_s5 + $0x50] sm:$0xff] %v376_v2 }
 0x245   :  { %409 = vst [vmem:[%s859_s5 + $0x58] sm:$0xff] %v377_v4 }
 0x249   :  { %v329_v6 = vpop.permute.xlu0 %328 }
 0x24a   :  { %v384_v21 = vmul.f32 %v329_v6, %v530_v9  ;;  %v385_v62 = vmul.f32 %v329_v6, %v535_v10  ;;  %v298_v3 = vpop.permute.xlu1 %297 }
 0x24b   :  { %v374_v16 = vmul.f32 %v298_v3, %v586_v22  ;;  %v375_v27 = vmul.f32 %v298_v3, %v591_v23 }
 0x24c   :  { %416 = vst [vmem:[%s859_s5 + $0x90] sm:$0xff] %v384_v21 }
 0x24d   :  { %417 = vst [vmem:[%s859_s5 + $0x98] sm:$0xff] %v385_v62 }
 0x24e   :  { %406 = vst [vmem:[%s859_s5 + $0x40] sm:$0xff] %v374_v16 }
 0x24f   :  { %407 = vst [vmem:[%s859_s5 + $0x48] sm:$0xff] %v375_v27 }
 0x251   :  { %v316_v9 = vpop.permute.xlu2 %315 }
 0x252   :  { %v380_v10 = vmul.f32 %v316_v9, %v658_v40  ;;  %v381_v22 = vmul.f32 %v316_v9, %v663_v41 }
 0x254   :  { %412 = vst [vmem:[%s859_s5 + $0x70] sm:$0xff] %v380_v10 }
 0x255   :  { %413 = vst [vmem:[%s859_s5 + $0x78] sm:$0xff] %v381_v22 }
 0x259   :  { %v359_v23 = vpop.permute.xlu0 %358 }
 0x25a   :  { %v394_v28 = vmul.f32 %v359_v23, %v638_v36  ;;  %v395_v33 = vmul.f32 %v359_v23, %v643_v37  ;;  %v310_v34 = vpop.permute.xlu1 %309 }
 0x25b   :  { %v378_v42 = vmul.f32 %v310_v34, %v648_v38  ;;  %v379_v40 = vmul.f32 %v310_v34, %v653_v39 }
 0x25c   :  { %426 = vst [vmem:[%s859_s5 + $0xe0] sm:$0xff] %v394_v28 }
 0x25d   :  { %427 = vst [vmem:[%s859_s5 + $0xe8] sm:$0xff] %v395_v33 }
 0x25e   :  { %410 = vst [vmem:[%s859_s5 + $0x60] sm:$0xff] %v378_v42 }
 0x25f   :  { %411 = vst [vmem:[%s859_s5 + $0x68] sm:$0xff] %v379_v40 }
 0x261   :  { %v335_v36 = vpop.permute.xlu2 %334 }
 0x262   :  { %v386_v37 = vmul.f32 %v335_v36, %v550_v13  ;;  %v387_v38 = vmul.f32 %v335_v36, %v555_v14 }
 0x264   :  { %418 = vst [vmem:[%s859_s5 + $0xa0] sm:$0xff] %v386_v37 }
 0x265   :  { %419 = vst [vmem:[%s859_s5 + $0xa8] sm:$0xff] %v387_v38 }
 0x26a   :  { %v323_v39 = vpop.permute.xlu1 %322 }
 0x26b   :  { %v382_v41 = vmul.f32 %v323_v39, %v494_v0  ;;  %v383_v43 = vmul.f32 %v323_v39, %v499_v1 }
 0x26d   :  { %414 = vst [vmem:[%s859_s5 + $0x80] sm:$0xff] %v382_v41 }
 0x26e   :  { %415 = vst [vmem:[%s859_s5 + $0x88] sm:$0xff] %v383_v43 }
 0x271   :  { %v347_v13 = vpop.permute.xlu2 %346 }
 0x272   :  { %v390_v14 = vmul.f32 %v347_v13, %v612_v29  ;;  %v391_v15 = vmul.f32 %v347_v13, %v617_v30 }
 0x274   :  { %422 = vst [vmem:[%s859_s5 + $0xc0] sm:$0xff] %v390_v14 }
 0x275   :  { %423 = vst [vmem:[%s859_s5 + $0xc8] sm:$0xff] %v391_v15 }
 0x27a   :  { %v341_v0 = vpop.permute.xlu1 %340 }
 0x27b   :  { %v388_v1 = vmul.f32 %v341_v0, %v566_v18  ;;  %v389_v47 = vmul.f32 %v341_v0, %v571_v19  ;;  %v866_v19 = vld [vmem:[#allocation2_spill] sm:$0xff] }
 0x27d   :  { %420 = vst [vmem:[%s859_s5 + $0xb0] sm:$0xff] %v388_v1 }
 0x27e   :  { %421 = vst [vmem:[%s859_s5 + $0xb8] sm:$0xff] %v389_v47 }
 0x281   :  { %v365_v29 = vpop.permute.xlu2 %364 }
 0x282   :  { %v396_v30 = vmul.f32 %v365_v29, %v674_v45  ;;  %v397_v35 = vmul.f32 %v365_v29, %v679_v46 }
 0x284   :  { %428 = vst [vmem:[%s859_s5 + $0xf0] sm:$0xff] %v396_v30 }
 0x285   :  { %429 = vst [vmem:[%s859_s5 + $0xf8] sm:$0xff] %v397_v35 }
 0x28a   :  { %v353_v18 = vpop.permute.xlu1 %352 }
 0x28b   :  { %v392_v48 = vmul.f32 %v353_v18, %v866_v19  ;;  %v393_v52 = vmul.f32 %v353_v18, %v867_v53 }
 0x28d   :  { %424 = vst [vmem:[%s859_s5 + $0xd0] sm:$0xff] %v392_v48 }
 0x28e   :  { %425 = vst [vmem:[%s859_s5 + $0xd8] sm:$0xff] %v393_v52 }

</bundles_post_ra>
